<compile_context>
chip_gen: v6e
topology: v6e:2x2x1
jax: 0.10.0
libtpu: 0.0.40
codegen_flags: <defaults>
</compile_context>

<pallas_src>
import functools

import jax
import jax.numpy as jnp
import numpy as np
from jax.experimental import pallas as pl
from jax.experimental.pallas import tpu as pltpu


def _round_up(x: int, m: int) -> int:
    return ((x + m - 1) // m) * m


# Detect v7x (2 TensorCores per chip) once at import time; default to 1 TC.
try:
    _TWO_TC = "v7" in jax.devices()[0].device_kind.lower()
except Exception:  # pragma: no cover
    _TWO_TC = False

_MAX_TILE_B = 4096  # (32, 4096) f32 activation = 512 KiB; keeps huge batches pipelined.


def _pick_batch_tiling(batch: int, two_cores: bool):
    """Lane-granular (128) batch padding; 1 grid step (v5e/v6e) or 2 (v7x)."""
    b_pad = _round_up(max(batch, 1), 128)
    n_steps = 2 if (two_cores and b_pad >= 256) else 1
    n_steps = max(n_steps, pl.cdiv(b_pad, _MAX_TILE_B))
    tile_b = _round_up(pl.cdiv(b_pad, n_steps), 128)
    b_pad = n_steps * tile_b
    return b_pad, tile_b, n_steps


def critic_kernel(sT_ref, aT_ref,
                  w1s_ref, w1a_ref, b1_ref,
                  w2_ref, b2_ref,
                  w3_ref, b3_ref,
                  out_ref):
    # .float() semantics from the PyTorch module; batch is the lane axis.
    sT = sT_ref[...].astype(jnp.float32)      # (n_state,  tile_b)
    aT = aT_ref[...].astype(jnp.float32)      # (n_action, tile_b)

    # h1_T = relu(W1_s @ s_T + W1_a @ a_T + b1)        -> (F, tile_b)
    h1 = (jnp.dot(w1s_ref[...], sT, preferred_element_type=jnp.float32)
          + jnp.dot(w1a_ref[...], aT, preferred_element_type=jnp.float32)
          + b1_ref[...])
    h1 = jnp.maximum(h1, 0.0)

    # h2_T = relu(W2 @ h1_T + b2)                      -> (F, tile_b)
    h2 = jnp.dot(w2_ref[...], h1, preferred_element_type=jnp.float32) + b2_ref[...]
    h2 = jnp.maximum(h2, 0.0)

    # q_T = W3 @ h2_T + b3                             -> (n_out, tile_b), lane-dense store
    out_ref[...] = (jnp.dot(w3_ref[...], h2, preferred_element_type=jnp.float32)
                    + b3_ref[...])


def prepare_params(params, n_state):
    """One-time conversion from the PyTorch layout to the kernel layout.

    PyTorch:  W (out, in), b (out,)
    Kernel:   W1 split along its input axis into (F, n_state) and (F, n_action);
              W2 kept as (F, F); W3 kept as (n_out, F);
              b1/b2 as (F, 1); b3 as (n_out, 1)  (broadcast over the lane axis).
    """
    w1, b1, w2, b2, w3, b3 = params
    return (w1[:, :n_state],                  # W1_state  (F, n_state)
            w1[:, n_state:],                  # W1_action (F, n_action)
            b1.reshape(-1, 1),                # (F, 1)
            w2,                               # (F, F)
            b2.reshape(-1, 1),                # (F, 1)
            w3,                               # (n_out, F)
            b3.reshape(-1, 1))                # (n_out, 1)


@jax.jit
def critic_forward(state, action, kparams):
    """CriticNetwork forward. `kparams` must come from prepare_params()."""
    w1s, w1a, b1, w2, b2, w3, b3 = kparams
    B = state.shape[0]
    n_state = state.shape[1]
    n_action = action.shape[1]
    F = w2.shape[0]
    n_output = w3.shape[0]

    b_pad, tile_b, n_steps = _pick_batch_tiling(B, _TWO_TC)

    # Wrapper-side transpose of tiny (B, 3)/(B, 1) arrays -> lane-dense inputs.
    sT = jnp.pad(state.T, ((0, 0), (0, b_pad - B)))
    aT = jnp.pad(action.T, ((0, 0), (0, b_pad - B)))

    const = lambda i: (0, 0)   # weights/biases: constant block index -> DMA'd once.
    batched = lambda i: (0, i)

    flops = 2 * b_pad * ((n_state + n_action) * F + F * F + F * n_output)
    bytes_accessed = 4 * (b_pad * (n_state + n_action + n_output)
                          + (n_state + n_action) * F + F * F
                          + F * n_output + 2 * F + n_output)

    q_t = pl.pallas_call(
        critic_kernel,
        out_shape=jax.ShapeDtypeStruct((n_output, b_pad), jnp.float32),
        grid=(n_steps,),
        in_specs=[
            pl.BlockSpec((n_state, tile_b), batched),    # state^T  tile
            pl.BlockSpec((n_action, tile_b), batched),   # action^T tile
            pl.BlockSpec(w1s.shape, const),
            pl.BlockSpec(w1a.shape, const),
            pl.BlockSpec(b1.shape, const),
            pl.BlockSpec(w2.shape, const),
            pl.BlockSpec(b2.shape, const),
            pl.BlockSpec(w3.shape, const),
            pl.BlockSpec(b3.shape, const),
        ],
        out_specs=pl.BlockSpec((n_output, tile_b), batched),
        compiler_params=pltpu.CompilerParams(
            dimension_semantics=("parallel",)),
        cost_estimate=pl.CostEstimate(flops=flops, transcendentals=0,
                                      bytes_accessed=bytes_accessed),
    )(sT, aT, w1s, w1a, b1, w2, b2, w3, b3)

    q_t = q_t[:, :B]            # drop batch padding (padded lanes hold garbage)
    # torch.squeeze semantics on q of shape (B, n_output).
    return jnp.squeeze(q_t.T)


# ----------------------------- init (PyTorch-equivalent) -----------------------------

def xavier_uniform(key, shape, gain):
    fan_out, fan_in = shape                   # PyTorch Linear weight is (out, in)
    bound = gain * np.sqrt(6.0 / (fan_in + fan_out))
    return jax.random.uniform(key, shape, jnp.float32, -bound, bound)


def linear_bias(key, fan_in, n_out):
    bound = 1.0 / np.sqrt(fan_in)
    return jax.random.uniform(key, (n_out,), jnp.float32, -bound, bound)


def init_params(key, n_input, n_features, n_output):
    k = jax.random.split(key, 6)
    gain_relu = np.sqrt(2.0)                  # nn.init.calculate_gain('relu')
    gain_lin = 1.0                            # nn.init.calculate_gain('linear')
    w1 = xavier_uniform(k[0], (n_features, n_input), gain_relu)
    b1 = linear_bias(k[1], n_input, n_features)
    w2 = xavier_uniform(k[2], (n_features, n_features), gain_relu)
    b2 = linear_bias(k[3], n_features, n_features)
    w3 = xavier_uniform(k[4], (n_output, n_features), gain_lin)
    b3 = linear_bias(k[5], n_features, n_output)
    return (w1, b1, w2, b2, w3, b3)


if __name__ == "__main__":
    # Pendulum SAC: state dim 3, action dim 1 -> critic input dim 4, output (1,).
    B, n_state, n_action, n_features, n_output = 8, 3, 1, 32, 1
    n_input = n_state + n_action

    key = jax.random.PRNGKey(0)
    k_params, k_state, k_action = jax.random.split(key, 3)

    params = init_params(k_params, n_input, n_features, n_output)
    state = jax.random.normal(k_state, (B, n_state), jnp.float32)
    action = jax.random.normal(k_action, (B, n_action), jnp.float32)

    # One-time param prep (outside the forward path).
    kparams = prepare_params(params, n_state)

    q = critic_forward(state, action, kparams)
    q = jax.block_until_ready(q)

    # Pure-JAX reference check against the original PyTorch-layout params.
    w1, b1, w2, b2, w3, b3 = params
    x = jnp.concatenate([state, action], axis=1)
    h1 = jax.nn.relu(x @ w1.T + b1)
    h2 = jax.nn.relu(h1 @ w2.T + b2)
    q_ref = jnp.squeeze(h2 @ w3.T + b3)
    assert q.shape == (B,), q.shape
    np.testing.assert_allclose(np.asarray(q), np.asarray(q_ref), rtol=1e-5, atol=1e-5)

    print("KERNEL_OK")
</pallas_src>

<mosaic_0001>
module attributes {stable_mosaic.version = 11 : i64} {
  func.func @critic_kernel(%arg0: i32, %arg1: memref<3x128xf32, #tpu.memory_space<vmem>>, %arg2: memref<1x128xf32, #tpu.memory_space<vmem>>, %arg3: memref<32x3xf32, #tpu.memory_space<vmem>>, %arg4: memref<32x1xf32, #tpu.memory_space<vmem>>, %arg5: memref<32x1xf32, #tpu.memory_space<vmem>>, %arg6: memref<32x32xf32, #tpu.memory_space<vmem>>, %arg7: memref<32x1xf32, #tpu.memory_space<vmem>>, %arg8: memref<1x32xf32, #tpu.memory_space<vmem>>, %arg9: memref<1x1xf32, #tpu.memory_space<vmem>>, %arg10: memref<1x128xf32, #tpu.memory_space<vmem>>) attributes {dimension_semantics = [#tpu.dimension_semantics<parallel>], iteration_bounds = array<i64: 1>, scalar_prefetch = 0 : i64, scratch_operands = 0 : i64, tpu.core_type = #tpu.core_type<tc>, window_params = [{transform_indices = @transform_0, window_bounds = array<i64: 3, 128>}, {transform_indices = @transform_1, window_bounds = array<i64: 1, 128>}, {pipeline_mode = #tpu.pipeline_mode<synchronous>, transform_indices = @transform_2, window_bounds = array<i64: 32, 3>}, {pipeline_mode = #tpu.pipeline_mode<synchronous>, transform_indices = @transform_3, window_bounds = array<i64: 32, 1>}, {pipeline_mode = #tpu.pipeline_mode<synchronous>, transform_indices = @transform_4, window_bounds = array<i64: 32, 1>}, {pipeline_mode = #tpu.pipeline_mode<synchronous>, transform_indices = @transform_5, window_bounds = array<i64: 32, 32>}, {pipeline_mode = #tpu.pipeline_mode<synchronous>, transform_indices = @transform_6, window_bounds = array<i64: 32, 1>}, {pipeline_mode = #tpu.pipeline_mode<synchronous>, transform_indices = @transform_7, window_bounds = array<i64: 1, 32>}, {pipeline_mode = #tpu.pipeline_mode<synchronous>, transform_indices = @transform_8, window_bounds = array<i64: 1, 1>}, {transform_indices = @transform_9, window_bounds = array<i64: 1, 128>}]} {
    %c0 = arith.constant 0 : index
    %c0_0 = arith.constant 0 : index
    %0 = vector.load %arg1[%c0, %c0_0] : memref<3x128xf32, #tpu.memory_space<vmem>>, vector<3x128xf32>
    %c0_1 = arith.constant 0 : index
    %c0_2 = arith.constant 0 : index
    %1 = vector.load %arg2[%c0_1, %c0_2] : memref<1x128xf32, #tpu.memory_space<vmem>>, vector<1x128xf32>
    %c0_3 = arith.constant 0 : index
    %c0_4 = arith.constant 0 : index
    %2 = vector.load %arg3[%c0_3, %c0_4] : memref<32x3xf32, #tpu.memory_space<vmem>>, vector<32x3xf32>
    %cst = arith.constant dense<0.000000e+00> : vector<32x128xf32>
    %3 = tpu.matmul %2, %0, %cst {dimension_numbers = #tpu.dot_dimension_numbers<[1], [0], [0], [1], [0, 0, 1, 1], [], []>} : vector<32x3xf32>, vector<3x128xf32>, vector<32x128xf32> -> vector<32x128xf32>
    %c0_5 = arith.constant 0 : index
    %c0_6 = arith.constant 0 : index
    %4 = vector.load %arg4[%c0_5, %c0_6] : memref<32x1xf32, #tpu.memory_space<vmem>>, vector<32x1xf32>
    %cst_7 = arith.constant dense<0.000000e+00> : vector<32x128xf32>
    %5 = tpu.matmul %4, %1, %cst_7 {dimension_numbers = #tpu.dot_dimension_numbers<[1], [0], [0], [1], [0, 0, 1, 1], [], []>} : vector<32x1xf32>, vector<1x128xf32>, vector<32x128xf32> -> vector<32x128xf32>
    %6 = arith.addf %3, %5 : vector<32x128xf32>
    %c0_8 = arith.constant 0 : index
    %c0_9 = arith.constant 0 : index
    %7 = vector.load %arg5[%c0_8, %c0_9] : memref<32x1xf32, #tpu.memory_space<vmem>>, vector<32x1xf32>
    %8 = vector.broadcast %7 : vector<32x1xf32> to vector<32x128xf32>
    %9 = arith.addf %6, %8 : vector<32x128xf32>
    %cst_10 = arith.constant 0.000000e+00 : f32
    %10 = vector.broadcast %cst_10 : f32 to vector<32x128xf32>
    %11 = arith.maximumf %9, %10 : vector<32x128xf32>
    %c0_11 = arith.constant 0 : index
    %c0_12 = arith.constant 0 : index
    %12 = vector.load %arg6[%c0_11, %c0_12] : memref<32x32xf32, #tpu.memory_space<vmem>>, vector<32x32xf32>
    %cst_13 = arith.constant dense<0.000000e+00> : vector<32x128xf32>
    %13 = tpu.matmul %12, %11, %cst_13 {dimension_numbers = #tpu.dot_dimension_numbers<[1], [0], [0], [1], [0, 0, 1, 1], [], []>} : vector<32x32xf32>, vector<32x128xf32>, vector<32x128xf32> -> vector<32x128xf32>
    %c0_14 = arith.constant 0 : index
    %c0_15 = arith.constant 0 : index
    %14 = vector.load %arg7[%c0_14, %c0_15] : memref<32x1xf32, #tpu.memory_space<vmem>>, vector<32x1xf32>
    %15 = vector.broadcast %14 : vector<32x1xf32> to vector<32x128xf32>
    %16 = arith.addf %13, %15 : vector<32x128xf32>
    %cst_16 = arith.constant 0.000000e+00 : f32
    %17 = vector.broadcast %cst_16 : f32 to vector<32x128xf32>
    %18 = arith.maximumf %16, %17 : vector<32x128xf32>
    %c0_17 = arith.constant 0 : index
    %c0_18 = arith.constant 0 : index
    %19 = vector.load %arg8[%c0_17, %c0_18] : memref<1x32xf32, #tpu.memory_space<vmem>>, vector<1x32xf32>
    %cst_19 = arith.constant dense<0.000000e+00> : vector<1x128xf32>
    %20 = tpu.matmul %19, %18, %cst_19 {dimension_numbers = #tpu.dot_dimension_numbers<[1], [0], [0], [1], [0, 0, 1, 1], [], []>} : vector<1x32xf32>, vector<32x128xf32>, vector<1x128xf32> -> vector<1x128xf32>
    %c0_20 = arith.constant 0 : index
    %c0_21 = arith.constant 0 : index
    %21 = vector.load %arg9[%c0_20, %c0_21] : memref<1x1xf32, #tpu.memory_space<vmem>>, vector<1x1xf32>
    %22 = vector.broadcast %21 : vector<1x1xf32> to vector<1x128xf32>
    %23 = arith.addf %20, %22 : vector<1x128xf32>
    %c0_22 = arith.constant 0 : index
    %c0_23 = arith.constant 0 : index
    %24 = vector.load %arg10[%c0_22, %c0_23] : memref<1x128xf32, #tpu.memory_space<vmem>>, vector<1x128xf32>
    tpu.vector_store %arg10[%c0_22, %c0_23], %23 {strides = array<i32>} : memref<1x128xf32, #tpu.memory_space<vmem>>, vector<1x128xf32>,
    return
  }
  func.func @transform_0(%arg0: i32) -> (i32, i32) {
    %c0_i32 = arith.constant 0 : i32
    %c0_i32_0 = arith.constant 0 : i32
    return %c0_i32, %arg0 : i32, i32
  }
  func.func @transform_1(%arg0: i32) -> (i32, i32) {
    %c0_i32 = arith.constant 0 : i32
    %c0_i32_0 = arith.constant 0 : i32
    return %c0_i32, %arg0 : i32, i32
  }
  func.func @transform_2(%arg0: i32) -> (i32, i32) {
    %c0_i32 = arith.constant 0 : i32
    %c0_i32_0 = arith.constant 0 : i32
    %c0_i32_1 = arith.constant 0 : i32
    return %c0_i32, %c0_i32_0 : i32, i32
  }
  func.func @transform_3(%arg0: i32) -> (i32, i32) {
    %c0_i32 = arith.constant 0 : i32
    %c0_i32_0 = arith.constant 0 : i32
    %c0_i32_1 = arith.constant 0 : i32
    return %c0_i32, %c0_i32_0 : i32, i32
  }
  func.func @transform_4(%arg0: i32) -> (i32, i32) {
    %c0_i32 = arith.constant 0 : i32
    %c0_i32_0 = arith.constant 0 : i32
    %c0_i32_1 = arith.constant 0 : i32
    return %c0_i32, %c0_i32_0 : i32, i32
  }
  func.func @transform_5(%arg0: i32) -> (i32, i32) {
    %c0_i32 = arith.constant 0 : i32
    %c0_i32_0 = arith.constant 0 : i32
    %c0_i32_1 = arith.constant 0 : i32
    return %c0_i32, %c0_i32_0 : i32, i32
  }
  func.func @transform_6(%arg0: i32) -> (i32, i32) {
    %c0_i32 = arith.constant 0 : i32
    %c0_i32_0 = arith.constant 0 : i32
    %c0_i32_1 = arith.constant 0 : i32
    return %c0_i32, %c0_i32_0 : i32, i32
  }
  func.func @transform_7(%arg0: i32) -> (i32, i32) {
    %c0_i32 = arith.constant 0 : i32
    %c0_i32_0 = arith.constant 0 : i32
    %c0_i32_1 = arith.constant 0 : i32
    return %c0_i32, %c0_i32_0 : i32, i32
  }
  func.func @transform_8(%arg0: i32) -> (i32, i32) {
    %c0_i32 = arith.constant 0 : i32
    %c0_i32_0 = arith.constant 0 : i32
    %c0_i32_1 = arith.constant 0 : i32
    return %c0_i32, %c0_i32_0 : i32, i32
  }
  func.func @transform_9(%arg0: i32) -> (i32, i32) {
    %c0_i32 = arith.constant 0 : i32
    %c0_i32_0 = arith.constant 0 : i32
    return %c0_i32, %arg0 : i32, i32
  }
}

</mosaic_0001>

<bundles_post_ra>
// kernel: critic_forward.1
= control target key start
LH: loop header
LB: loop body
LE: loop exit
PB: predicated region body
PF: predicated region fallthrough
CT: control target
= control target key end

     0   :  { %vm57_vm0 = vcmask 1040384   ;;  %vm159_vm1 = vcmask 1042432   ;;  %vm44_vm2 = vcmask 7168   ;;  %vm146_vm3 = vcmask 23552   ;;  %s728_s1 = inlined_call_operand.vmem [shape: f32[1,128], index: 1, kind: input, shape index: {}]   ;;  %s729_s0 = inlined_call_operand.vmem [shape: f32[3,128], index: 0, kind: input, shape index: {}]   ;;  %s730_s3 = inlined_call_operand.vmem [shape: f32[32,1], index: 3, kind: input, shape index: {}]   ;;  %s731_s2 = inlined_call_operand.vmem [shape: f32[32,3], index: 2, kind: input, shape index: {}]   ;;  %s732_s8 = inlined_call_operand.<no memory space> [shape: f32[1,1], index: 8, kind: input, shape index: {}]   ;;  %s733_s4 = inlined_call_operand.vmem [shape: f32[32,1], index: 4, kind: input, shape index: {}]   ;;  %s734_s6 = inlined_call_operand.vmem [shape: f32[32,1], index: 6, kind: input, shape index: {}]   ;;  %s735_s5 = inlined_call_operand.vmem [shape: f32[32,32], index: 5, kind: input, shape index: {}]   ;;  %s736_s7 = inlined_call_operand.vmem [shape: f32[1,32], index: 7, kind: input, shape index: {}]   ;;  %s737_s9 = inlined_call_operand.vmem [shape: f32[1,128], index: 9, kind: output, shape index: {}]  }
   0x1   :  { %v35_v0 = vld [vmem:[%s728_s1] sm:$0x1]  ;;  %v14_v3 = vstv %s732_s8  ;;  %v41_v5 = vld [vmem:[%s730_s3 + $0x8] sm:$0xff]  ;;  %v42_v7 = vld [vmem:[%s730_s3 + $0x10] sm:$0xff]  ;;  %v583_v13 = vmov 0   ;;  %vm308_vm4 = vcmask 261120  }
   0x2   :  { %v34_v1 = vld [vmem:[%s729_s0] sm:$0x7]  ;;  %537 = vmatprep.subr.msk.mxu0 %vm57_vm0, %v35_v0  ;;  %v37_v6 = vld [vmem:[%s731_s2 + $0x8] sm:$0xff]  ;;  %15 = vst [vmem:[#allocation2] sm:$0x1] %v14_v3  ;;  %v38_v8 = vld [vmem:[%s731_s2 + $0x10] sm:$0xff]  ;;  %581 = vset.pattern.permute.xlu0 %v583_v13  ;;  %v417_v3 = vlaneseq }
   0x3   :  { %v40_v2 = vld [vmem:[%s730_s3] sm:$0xff]  ;;  %545 = vmatprep.subr.msk.mxu1 %vm159_vm1, %v34_v1  ;;  %538 = vmatpush3.msk.msra.mxu0 %vm57_vm0, %v35_v0  ;;  %v251_v9 = vld [vmem:[%s733_s4 + $0x18] sm:$0xff]  ;;  %v249_v10 = vld [vmem:[%s733_s4 + $0x8] sm:$0xff]  ;;  %v584_v49 = vmov 0.0   ;;  %vm585_vm5 = vmmov 0  }
   0x4   :  { %v36_v4 = vld [vmem:[%s731_s2] sm:$0xff]  ;;  %539 = vmatprep.mubr.msk.f32.mxu0 %vm44_vm2, %v40_v2  ;;  %546 = vmatpush3.msk.msra.mxu1 %vm159_vm1, %v34_v1  ;;  %v43_v11 = vld [vmem:[%s730_s3 + $0x18] sm:$0xff]  ;;  %v250_v14 = vld [vmem:[%s733_s4 + $0x10] sm:$0xff] }
   0x5   :  { %547 = vmatprep.mubr.msk.f32.mxu1 %vm146_vm3, %v36_v4  ;;  %540 = vmatmul.mubr.msk.f32.vlgmr.msra.gmra.mxu0 %vm44_vm2, %v41_v5  ;;  %v39_v12 = vld [vmem:[%s731_s2 + $0x18] sm:$0xff]  ;;  %v248_v15 = vld [vmem:[%s733_s4] sm:$0xff]  ;;  %v286_v17 = vld [vmem:[%s734_s6 + $0x10] sm:$0xff]  ;;  %v418_v4 = vshrl.u32 %v417_v3, 7 }
   0x6   :  { %548 = vmatmul.mubr.msk.f32.vlgmr.msra.gmra.mxu1 %vm146_vm3, %v37_v6  ;;  %542 = vmatprep.mubr.msk.f32.mxu0 %vm44_vm2, %v42_v7  ;;  %v287_v16 = vld [vmem:[%s734_s6 + $0x18] sm:$0xff]  ;;  %v285_v18 = vld [vmem:[%s734_s6 + $0x8] sm:$0xff]  ;;  %v284_v19 = vld [vmem:[%s734_s6] sm:$0xff] }
   0x7   :  { %550 = vmatprep.mubr.msk.f32.mxu1 %vm146_vm3, %v38_v8  ;;  %582 = vset.pattern.permute.xlu1 %v583_v13  ;;  %v280_v21 = vld [vmem:[%s735_s5] sm:$0xff]  ;;  %v281_v46 = vld [vmem:[%s735_s5 + $0x8] sm:$0xff]  ;;  %v282_v47 = vld [vmem:[%s735_s5 + $0x10] sm:$0xff]  ;;  %v419_v5 = vsub.s32 0, %v418_v4 }
   0x8   :  { %269 = vperm.xlu0 %581, %v251_v9   ;;  %259 = vperm.xlu1 %582, %v249_v10   ;;  %v283_v48 = vld [vmem:[%s735_s5 + $0x18] sm:$0xff]  ;;  %v410_v2 = vld [vmem:[%s736_s7] sm:$0x1] }
   0x9   :  { %543 = vmatmul.mubr.msk.f32.gmra.mxu0 %vm44_vm2, %v43_v11  ;;  %v411_v20 = vld [vmem:[#allocation2] sm:$0x1]  ;;  %567 = vmatprep.subr.mxu1 %v584_v49 }
   0xa   :  { %551 = vmatmul.mubr.msk.f32.gmra.mxu1 %vm146_vm3, %v39_v12  ;;  %561 = vmatprep.mubr.msk.f32.mxu0 %vm308_vm4, %v280_v21 }
   0xb   :  { %575 = vmatprep.mubr.msk.f32.mxu1 %vm585_vm5, %v584_v49 }
   0xc   :  { %264 = vperm.xlu0 %581, %v250_v14   ;;  %254 = vperm.xlu1 %582, %v248_v15  }
  0x10   :  { %305 = vperm.xlu0 %581, %v287_v16   ;;  %300 = vperm.xlu1 %582, %v286_v17  }
  0x14   :  { %295 = vperm.xlu0 %581, %v285_v18   ;;  %290 = vperm.xlu1 %582, %v284_v19  }
  0x18   :  { %414 = vperm.xlu0 %581, %v411_v20  }
  0x83   :  { %v270_v24 = vpop.permute.xlu0 %269  ;;  %v260_v27 = vpop.permute.xlu1 %259 }
  0x87   :  { %v265_v37 = vpop.permute.xlu0 %264  ;;  %v255_v41 = vpop.permute.xlu1 %254 }
  0x8b   :  { %v306_v50 = vpop.permute.xlu0 %305  ;;  %v301_v52 = vpop.permute.xlu1 %300 }
  0x8f   :  { %v296_v56 = vpop.permute.xlu0 %295  ;;  %v291_v61 = vpop.permute.xlu1 %290 }
  0x93   :  { %v415_v6 = vpop.permute.xlu0 %414 }
  0x94   :  { %v420_v7 = vrot.slane %v415_v6, %v419_v5 }
  0xc5   :  { %v541_v22 = vpop.f32.mrf.mxu0 }
  0xc6   :  { %v549_v23 = vpop.f32.mrf.mxu1 }
  0xc7   :  { %v127_v25 = vpop.f32.mrf.mxu0  ;;  %v235_v30 = vadd.f32 %v549_v23, %v541_v22 }
  0xc8   :  { %v229_v26 = vpop.f32.mrf.mxu1 }
  0xc9   :  { %v544_v28 = vpop.f32.mrf.mxu0  ;;  %v230_v34 = vadd.f32 %v229_v26, %v127_v25  ;;  %v273_v38 = vadd.f32 %v260_v27, %v235_v30 }
  0xca   :  { %v552_v29 = vpop.f32.mrf.mxu1 }
  0xcb   :  { %v245_v31 = vadd.f32 %v552_v29, %v544_v28  ;;  %v137_v32 = vpop.f32.mrf.mxu0  ;;  %v272_v42 = vadd.f32 %v255_v41, %v230_v34  ;;  %v277_v44 = vmax.f32 %v273_v38, 0.0 }
  0xcc   :  { %v239_v33 = vpop.f32.mrf.mxu1 }
  0xcd   :  { %v275_v35 = vadd.f32 %v270_v24, %v245_v31  ;;  %v240_v36 = vadd.f32 %v239_v33, %v137_v32  ;;  %v276_v45 = vmax.f32 %v272_v42, 0.0 }
  0xcf   :  { %v279_v39 = vmax.f32 %v275_v35, 0.0  ;;  %v274_v40 = vadd.f32 %v265_v37, %v240_v36 }
  0xd1   :  { %v278_v43 = vmax.f32 %v274_v40, 0.0  ;;  %553 = vmatprep.subr.mxu0 %v279_v39 }
  0xd2   :  { %554 = vmatpush3.msra.mxu0 %v279_v39 }
  0xd3   :  { %555 = vmatprep.subr.mxu0 %v278_v43 }
  0xd4   :  { %556 = vmatpush3.msra.mxu0 %v278_v43 }
  0xd5   :  { %557 = vmatprep.subr.mxu0 %v277_v44 }
  0xd6   :  { %558 = vmatpush3.msra.mxu0 %v277_v44 }
  0xd7   :  { %559 = vmatprep.subr.mxu0 %v276_v45 }
  0xd8   :  { %560 = vmatpush3.msra.mxu0 %v276_v45 }
  0xd9   :  { %562 = vmatmul.mubr.msk.f32.vlgmr.msra.gmra.mxu0 %vm308_vm4, %v281_v46 }
  0xda   :  { %564 = vmatprep.mubr.msk.f32.mxu0 %vm308_vm4, %v282_v47 }
  0xdd   :  { %565 = vmatmul.mubr.msk.f32.gmra.mxu0 %vm308_vm4, %v283_v48 }
 0x199   :  { %v563_v51 = vpop.f32.mrf.mxu0 }
 0x19a   :  { %v393_v58 = vadd.f32 %v563_v51, %v296_v56 }
 0x19b   :  { %v387_v53 = vpop.f32.mrf.mxu0 }
 0x19c   :  { %v388_v62 = vadd.f32 %v387_v53, %v291_v61  ;;  %v407_v0 = vmax.f32 %v393_v58, 0.0 }
 0x19d   :  { %v566_v54 = vpop.f32.mrf.mxu0 }
 0x19e   :  { %v403_v55 = vadd.f32 %v566_v54, %v306_v50  ;;  %v406_v1 = vmax.f32 %v388_v62, 0.0 }
 0x19f   :  { %v397_v57 = vpop.f32.mrf.mxu0 }
 0x1a0   :  { %v409_v59 = vmax.f32 %v403_v55, 0.0  ;;  %v398_v60 = vadd.f32 %v397_v57, %v301_v52 }
 0x1a2   :  { %v408_v63 = vmax.f32 %v398_v60, 0.0  ;;  %568 = vmatpush3.msra.mxu1 %v409_v59 }
 0x1a3   :  { %569 = vmatprep.subr.mxu1 %v584_v49 }
 0x1a4   :  { %570 = vmatpush3.msra.mxu1 %v408_v63 }
 0x1a5   :  { %571 = vmatprep.subr.mxu1 %v584_v49 }
 0x1a6   :  { %572 = vmatpush3.msra.mxu1 %v407_v0 }
 0x1a7   :  { %573 = vmatprep.subr.mxu1 %v584_v49 }
 0x1a8   :  { %574 = vmatpush3.msra.mxu1 %v406_v1 }
 0x1a9   :  { %576 = vmatmul.mubr.msk.f32.vlgmr.msra.gmra.mxu1 %vm308_vm4, %v410_v2 }
 0x269   :  { %v490_v8 = vpop.f32.mrf.mxu1 }
 0x26a   :  { %v491_v9 = vadd.f32 %v490_v8, %v420_v7 }
 0x26b   :  { %v577_v10 = vpop.f32.mrf.mxu1 }
 0x26c   :  { %494 = vst [vmem:[%s737_s9] sm:$0x1] %v491_v9 }

</bundles_post_ra>
